<compile_context>
chip_gen: v6e
topology: v6e:2x2x1
jax: 0.10.0
libtpu: 0.0.40
codegen_flags: <defaults>
</compile_context>

<pallas_src>
import jax
import jax.numpy as jnp
from jax import lax
from jax.experimental import pallas as pl
from jax.experimental.pallas import tpu as pltpu

OUT_PAD = 128          # lane-dense padded output width
MXU_DTYPE = jnp.bfloat16


def _round_up(x, m):
    return ((x + m - 1) // m) * m


def _linear_mlp_kernel(x_ref, w1_ref, b1_ref, w2p_ref, b2p_ref, o_ref):
    # hidden layer: (tm, In) . (H, In)^T  -> (tm, H), f32 accumulation on MXU
    h = lax.dot_general(
        x_ref[...], w1_ref[...],
        dimension_numbers=(((1,), (1,)), ((), ())),
        preferred_element_type=jnp.float32)
    # dropout (eval mode) is identity; bias + ReLU in f32 on the VPU
    h = jnp.maximum(h + b1_ref[...], 0.0)
    # predict layer: (tm, H) . (OUT_PAD, H)^T -> (tm, OUT_PAD) lane-dense block
    out = lax.dot_general(
        h.astype(w2p_ref.dtype), w2p_ref[...],
        dimension_numbers=(((1,), (1,)), ((), ())),
        preferred_element_type=jnp.float32)
    o_ref[...] = (out + b2p_ref[...]).astype(o_ref.dtype)


def prepare_params(w1, b1, w2, b2):
    """One-time parameter prep (do this outside the hot path).

    w1: (H, In), b1: (H,), w2: (out, H), b2: (out,)  -- torch nn.Linear layout.
    Returns bf16 weights (predict weight/bias zero-padded to OUT_PAD columns).
    """
    H, _ = w1.shape
    out_features = w2.shape[0]
    w1_p = w1.astype(MXU_DTYPE)                                    # (H, In)
    b1_p = b1.reshape(1, H).astype(jnp.float32)                    # (1, H)
    w2_pad = jnp.zeros((OUT_PAD, H), MXU_DTYPE).at[:out_features].set(
        w2.astype(MXU_DTYPE))                                      # (OUT_PAD, H)
    b2_pad = jnp.zeros((1, OUT_PAD), jnp.float32).at[0, :out_features].set(
        b2.astype(jnp.float32))                                    # (1, OUT_PAD)
    return w1_p, b1_p, w2_pad, b2_pad, out_features


def linear_forward(x, w1_p, b1_p, w2_pad, b2_pad, out_features):
    """x: (B, In) f32; params from prepare_params(). Returns (B, out_features) f32."""
    B, In = x.shape
    H = w1_p.shape[0]

    # Batch tile: big enough to pipeline / hit HBM roofline, tiny VMEM footprint
    # (2 bufs * (tm*In*2B + tm*OUT_PAD*4B) + resident weights << 16 MiB scoped
    # limit even on v5e; comfortably inside v7x's 32 MiB scoped / 64 MiB physical).
    tm = min(512, _round_up(B, 8))
    B_pad = _round_up(B, tm)
    nb = B_pad // tm

    xk = x.astype(MXU_DTYPE)
    if B_pad != B:
        xk = jnp.pad(xk, ((0, B_pad - B), (0, 0)))

    flops = 2 * B_pad * (In * H + H * OUT_PAD)
    bytes_accessed = (B_pad * In * 2            # x (bf16)
                      + H * In * 2              # W1 (bf16)
                      + H * 4                   # b1
                      + OUT_PAD * H * 2         # W2 padded (bf16)
                      + OUT_PAD * 4             # b2 padded
                      + B_pad * OUT_PAD * 4)    # output (f32)

    out = pl.pallas_call(
        _linear_mlp_kernel,
        out_shape=jax.ShapeDtypeStruct((B_pad, OUT_PAD), jnp.float32),
        grid=(nb,),
        in_specs=[
            pl.BlockSpec((tm, In), lambda i: (i, 0)),        # x: batch-tiled
            pl.BlockSpec((H, In), lambda i: (0, 0)),         # W1: resident
            pl.BlockSpec((1, H), lambda i: (0, 0)),          # b1: resident
            pl.BlockSpec((OUT_PAD, H), lambda i: (0, 0)),    # W2 (padded): resident
            pl.BlockSpec((1, OUT_PAD), lambda i: (0, 0)),    # b2 (padded): resident
        ],
        out_specs=pl.BlockSpec((tm, OUT_PAD), lambda i: (i, 0)),
        compiler_params=pltpu.CompilerParams(
            dimension_semantics=("parallel",),     # megacore / v7x 2-TC sharding
            vmem_limit_bytes=32 * 1024 * 1024),
        cost_estimate=pl.CostEstimate(
            flops=flops, transcendentals=0, bytes_accessed=bytes_accessed),
    )(xk, w1_p, b1_p, w2_pad, b2_pad)

    return out[:B, :out_features]


if __name__ == "__main__":
    batch, input_size, hidden_size = 8, 32, 64

    key = jax.random.PRNGKey(0)
    kx, k1, k2, k3, k4 = jax.random.split(key, 5)

    x = jax.random.normal(kx, (batch, input_size), dtype=jnp.float32)

    # Deterministic parameter init (uniform, roughly matching nn.Linear scale).
    bound1 = 1.0 / (input_size ** 0.5)
    w1 = jax.random.uniform(k1, (hidden_size, input_size), jnp.float32, -bound1, bound1)
    b1 = jax.random.uniform(k2, (hidden_size,), jnp.float32, -bound1, bound1)
    bound2 = 1.0 / (hidden_size ** 0.5)
    w2 = jax.random.uniform(k3, (2, hidden_size), jnp.float32, -bound2, bound2)
    b2 = jax.random.uniform(k4, (2,), jnp.float32, -bound2, bound2)

    params = prepare_params(w1, b1, w2, b2)   # one-time prep, outside hot path
    out = linear_forward(x, *params)
    jax.block_until_ready(out)

    # Reference (eval-mode forward, f32). bf16 MXU inputs => loosened tolerance.
    ref = jnp.maximum(x @ w1.T + b1, 0.0) @ w2.T + b2
    assert out.shape == (batch, 2)
    assert jnp.allclose(out, ref, atol=3e-2, rtol=3e-2), (
        f"max abs err {jnp.max(jnp.abs(out - ref))}")

    print("KERNEL_OK")
</pallas_src>

<mosaic_0001>
module attributes {stable_mosaic.version = 11 : i64} {
  func.func @_linear_mlp_kernel(%arg0: i32, %arg1: memref<8x32xbf16, #tpu.memory_space<vmem>>, %arg2: memref<64x32xbf16, #tpu.memory_space<vmem>>, %arg3: memref<1x64xf32, #tpu.memory_space<vmem>>, %arg4: memref<128x64xbf16, #tpu.memory_space<vmem>>, %arg5: memref<1x128xf32, #tpu.memory_space<vmem>>, %arg6: memref<8x128xf32, #tpu.memory_space<vmem>>) attributes {dimension_semantics = [#tpu.dimension_semantics<parallel>], iteration_bounds = array<i64: 1>, scalar_prefetch = 0 : i64, scratch_operands = 0 : i64, tpu.core_type = #tpu.core_type<tc>, window_params = [{transform_indices = @transform_0, window_bounds = array<i64: 8, 32>}, {pipeline_mode = #tpu.pipeline_mode<synchronous>, transform_indices = @transform_1, window_bounds = array<i64: 64, 32>}, {pipeline_mode = #tpu.pipeline_mode<synchronous>, transform_indices = @transform_2, window_bounds = array<i64: 1, 64>}, {pipeline_mode = #tpu.pipeline_mode<synchronous>, transform_indices = @transform_3, window_bounds = array<i64: 128, 64>}, {pipeline_mode = #tpu.pipeline_mode<synchronous>, transform_indices = @transform_4, window_bounds = array<i64: 1, 128>}, {transform_indices = @transform_5, window_bounds = array<i64: 8, 128>}]} {
    %c0 = arith.constant 0 : index
    %c0_0 = arith.constant 0 : index
    %0 = vector.load %arg1[%c0, %c0_0] : memref<8x32xbf16, #tpu.memory_space<vmem>>, vector<8x32xbf16>
    %c0_1 = arith.constant 0 : index
    %c0_2 = arith.constant 0 : index
    %1 = vector.load %arg2[%c0_1, %c0_2] : memref<64x32xbf16, #tpu.memory_space<vmem>>, vector<64x32xbf16>
    %cst = arith.constant dense<0.000000e+00> : vector<8x64xf32>
    %2 = tpu.matmul %0, %1, %cst {dimension_numbers = #tpu.dot_dimension_numbers<[1], [1], [0], [0], [0, 0, 1, 0], [], []>} : vector<8x32xbf16>, vector<64x32xbf16>, vector<8x64xf32> -> vector<8x64xf32>
    %c0_3 = arith.constant 0 : index
    %c0_4 = arith.constant 0 : index
    %3 = vector.load %arg3[%c0_3, %c0_4] : memref<1x64xf32, #tpu.memory_space<vmem>>, vector<1x64xf32>
    %4 = vector.broadcast %3 : vector<1x64xf32> to vector<8x64xf32>
    %5 = arith.addf %2, %4 : vector<8x64xf32>
    %cst_5 = arith.constant 0.000000e+00 : f32
    %6 = vector.broadcast %cst_5 : f32 to vector<8x64xf32>
    %7 = arith.maximumf %5, %6 : vector<8x64xf32>
    %8 = arith.truncf %7 : vector<8x64xf32> to vector<8x64xbf16>
    %c0_6 = arith.constant 0 : index
    %c0_7 = arith.constant 0 : index
    %9 = vector.load %arg4[%c0_6, %c0_7] : memref<128x64xbf16, #tpu.memory_space<vmem>>, vector<128x64xbf16>
    %cst_8 = arith.constant dense<0.000000e+00> : vector<8x128xf32>
    %10 = tpu.matmul %8, %9, %cst_8 {dimension_numbers = #tpu.dot_dimension_numbers<[1], [1], [0], [0], [0, 0, 1, 0], [], []>} : vector<8x64xbf16>, vector<128x64xbf16>, vector<8x128xf32> -> vector<8x128xf32>
    %c0_9 = arith.constant 0 : index
    %c0_10 = arith.constant 0 : index
    %11 = vector.load %arg5[%c0_9, %c0_10] : memref<1x128xf32, #tpu.memory_space<vmem>>, vector<1x128xf32>
    %12 = vector.broadcast %11 : vector<1x128xf32> to vector<8x128xf32>
    %13 = arith.addf %10, %12 : vector<8x128xf32>
    %c0_11 = arith.constant 0 : index
    %c0_12 = arith.constant 0 : index
    %14 = vector.load %arg6[%c0_11, %c0_12] : memref<8x128xf32, #tpu.memory_space<vmem>>, vector<8x128xf32>
    tpu.vector_store %arg6[%c0_11, %c0_12], %13 {strides = array<i32>} : memref<8x128xf32, #tpu.memory_space<vmem>>, vector<8x128xf32>,
    return
  }
  func.func @transform_0(%arg0: i32) -> (i32, i32) {
    %c0_i32 = arith.constant 0 : i32
    %c0_i32_0 = arith.constant 0 : i32
    return %arg0, %c0_i32 : i32, i32
  }
  func.func @transform_1(%arg0: i32) -> (i32, i32) {
    %c0_i32 = arith.constant 0 : i32
    %c0_i32_0 = arith.constant 0 : i32
    %c0_i32_1 = arith.constant 0 : i32
    return %c0_i32, %c0_i32_0 : i32, i32
  }
  func.func @transform_2(%arg0: i32) -> (i32, i32) {
    %c0_i32 = arith.constant 0 : i32
    %c0_i32_0 = arith.constant 0 : i32
    %c0_i32_1 = arith.constant 0 : i32
    return %c0_i32, %c0_i32_0 : i32, i32
  }
  func.func @transform_3(%arg0: i32) -> (i32, i32) {
    %c0_i32 = arith.constant 0 : i32
    %c0_i32_0 = arith.constant 0 : i32
    %c0_i32_1 = arith.constant 0 : i32
    return %c0_i32, %c0_i32_0 : i32, i32
  }
  func.func @transform_4(%arg0: i32) -> (i32, i32) {
    %c0_i32 = arith.constant 0 : i32
    %c0_i32_0 = arith.constant 0 : i32
    %c0_i32_1 = arith.constant 0 : i32
    return %c0_i32, %c0_i32_0 : i32, i32
  }
  func.func @transform_5(%arg0: i32) -> (i32, i32) {
    %c0_i32 = arith.constant 0 : i32
    %c0_i32_0 = arith.constant 0 : i32
    return %arg0, %c0_i32 : i32, i32
  }
}

</mosaic_0001>

<bundles_post_ra>
// kernel: tpu_custom_call.1
= control target key start
LH: loop header
LB: loop body
LE: loop exit
PB: predicated region body
PF: predicated region fallthrough
CT: control target
= control target key end

     0   :  { %v361_v1 = vmov 0.0   ;;  %vm58_vm0 = vcmask 261120   ;;  %vm362_vm1 = vmmov 0   ;;  %vm179_vm2 = vcmask 523264   ;;  %s456_s0 = inlined_call_operand.vmem [shape: bf16[8,32], index: 0, kind: input, shape index: {}]   ;;  %s457_s1 = inlined_call_operand.vmem [shape: bf16[64,32], index: 1, kind: input, shape index: {}]   ;;  %s458_s2 = inlined_call_operand.vmem [shape: f32[1,64], index: 2, kind: input, shape index: {}]   ;;  %s459_s3 = inlined_call_operand.vmem [shape: bf16[128,64], index: 3, kind: input, shape index: {}]   ;;  %s460_s4 = inlined_call_operand.vmem [shape: f32[1,128], index: 4, kind: input, shape index: {}]   ;;  %s461_s5 = inlined_call_operand.hbm [shape: f32[8,128], index: 5, kind: output, shape index: {}]  }
   0x1   :  { %v327_v0 = vld [vmem:[%s457_s1 + $0x18] sm:$0xff]   ;;  %292 = vmatprep.subr.bf16.mxu0 %v361_v1  ;;  %304 = vmatprep.subr.bf16.mxu1 %v361_v1  ;;  %v328_v3 = vld [vmem:[%s457_s1 + $0x10] sm:$0xff]   ;;  %v329_v8 = vld [vmem:[%s457_s1 + $0x8] sm:$0xff]  }
   0x2   :  { %v72_v2 = vsel %vm58_vm0, %v327_v0, 0  ;;  %300 = vmatprep.mubr.msk.bf16.mxu0 %vm362_vm1, %v361_v1  ;;  %v331_v4 = vld [vmem:[%s459_s3 + $0x38] sm:$0xff]   ;;  %320 = vmatprep.mubr.msk.bf16.mxu1 %vm362_vm1, %v361_v1  ;;  %v69_v5 = vsel %vm58_vm0, %v328_v3, 0  ;;  %v332_v7 = vld [vmem:[%s459_s3 + $0x30] sm:$0xff]  }
   0x3   :  { %293 = vmatpush3.bf16.xpose.msra.mxu0 %v72_v2  ;;  %v205_v6 = vsel %vm179_vm2, %v331_v4, 0  ;;  %v202_v9 = vsel %vm179_vm2, %v332_v7, 0 }
   0x4   :  { %294 = vmatprep.subr.bf16.mxu0 %v361_v1  ;;  %305 = vmatpush3.bf16.xpose.msra.mxu1 %v205_v6 }
   0x5   :  { %306 = vmatprep.subr.bf16.mxu1 %v361_v1 }
   0xb   :  { %295 = vmatpush3.bf16.xpose.msra.mxu0 %v69_v5 }
   0xc   :  { %296 = vmatprep.subr.bf16.mxu0 %v361_v1 }
   0xd   :  { %10 = vsyncpa [#allocation3], 0  ;;  %v66_v10 = vsel %vm58_vm0, %v329_v8, 0  ;;  %307 = vmatpush3.bf16.xpose.msra.mxu1 %v202_v9  ;;  %v333_v11 = vld [vmem:[%s459_s3 + $0x28] sm:$0xff]   ;;  %v330_v12 = vld [vmem:[%s457_s1] sm:$0xff]  }
   0xe   :  { %308 = vmatprep.subr.bf16.mxu1 %v361_v1  ;;  %v199_v13 = vsel %vm179_vm2, %v333_v11, 0  ;;  %v63_v14 = vsel %vm58_vm0, %v330_v12, 0  ;;  %v334_v15 = vld [vmem:[%s459_s3 + $0x20] sm:$0xff]   ;;  %v335_v18 = vld [vmem:[%s459_s3 + $0x18] sm:$0xff]   ;;  %v336_v20 = vld [vmem:[%s459_s3 + $0x10] sm:$0xff]  }
   0xf   :  { %v196_v16 = vsel %vm179_vm2, %v334_v15, 0  ;;  %v22_v17 = vld [vmem:[%s456_s0] sm:$0xf]  ;;  %v193_v19 = vsel %vm179_vm2, %v335_v18, 0  ;;  %v190_v21 = vsel %vm179_vm2, %v336_v20, 0  ;;  %v337_v22 = vld [vmem:[%s459_s3 + $0x8] sm:$0xff]  }
  0x10   :  { %v187_v23 = vsel %vm179_vm2, %v337_v22, 0  ;;  %v338_v24 = vld [vmem:[%s459_s3] sm:$0xff]   ;;  %s363_s3 = smov [#allocation2]  }
  0x11   :  { %v184_v25 = vsel %vm179_vm2, %v338_v24, 0  ;;  %v262_v26 = vld [vmem:[%s458_s2] ss:$0 sm:$0xff]  ;;  %s254_s21 = sshll.u32 %s363_s3, 4  ;;  %s255_s21 = int_to_ptr.vmem [resolvable:$true] %s254_s21 }
  0x12   :  { %v268_v34 = vld [vmem:[%s460_s4] ss:$0 sm:$0xff]  ;;  %s339_s2 = scalar_lea.vmem %s255_s21, 128  ;;  %p344_p1 = scmp.lt.s32.totalorder %s255_s21, %s255_s21 }
  0x13   :  { %297 = vmatpush3.bf16.xpose.msra.mxu0 %v66_v10  ;;  %p340_p0 = scmp.ne.s32.totalorder %s255_s21, %s339_s2  ;;  %p345_p2 = scmp.lt.s32.totalorder %s339_s2, %s339_s2 }
  0x14   :  { %298 = vmatprep.subr.bf16.mxu0 %v361_v1 }
  0x15   :  { %309 = vmatpush3.bf16.xpose.msra.mxu1 %v199_v13  ;;  %p346_p3 = por %p345_p2, %p344_p1 }
  0x16   :  { %310 = vmatprep.subr.bf16.mxu1 %v361_v1 }
  0x17   :  { %p347_p4 = pnand %p346_p3, %p340_p0 }
  0x1b   :  { %299 = vmatpush3.bf16.xpose.msra.mxu0 %v63_v14 }
  0x1d   :  { %311 = vmatpush3.bf16.xpose.msra.mxu1 %v196_v16 }
  0x1e   :  { %312 = vmatprep.subr.bf16.mxu1 %v361_v1 }
  0x22   :  { %301 = vmatmul.mubr.msk.bf16.vlgmr.msra.gmra.mxu0 %vm58_vm0, %v22_v17 }
  0x25   :  { %313 = vmatpush3.bf16.xpose.msra.mxu1 %v193_v19 }
  0x26   :  { %314 = vmatprep.subr.bf16.mxu1 %v361_v1 }
  0x2d   :  { %315 = vmatpush3.bf16.xpose.msra.mxu1 %v190_v21 }
  0x2e   :  { %316 = vmatprep.subr.bf16.mxu1 %v361_v1 }
  0x35   :  { %317 = vmatpush3.bf16.xpose.msra.mxu1 %v187_v23 }
  0x36   :  { %318 = vmatprep.subr.bf16.mxu1 %v361_v1 }
  0x3d   :  { %319 = vmatpush3.bf16.xpose.msra.mxu1 %v184_v25 }
  0xe2   :  { %v108_v27 = vpop.f32.mrf.mxu0 }
  0xe3   :  { %v109_v28 = vadd.f32 %v262_v26, %v108_v27 }
  0xe4   :  { %v302_v29 = vpop.f32.mrf.mxu0 }
  0xe5   :  { %v114_v30 = vmax.f32 %v109_v28, 0.0 }
  0xe6   :  { %v111_v31 = vpop.f32.mrf.mxu0 }
  0xe7   :  { %v115_v32 = vpack.c.bf16 %v114_v30, %v114_v30 }
  0xe8   :  { %v303_v33 = vpop.f32.mrf.mxu0 }
  0xe9   :  { %321 = vmatmul.mubr.msk.bf16.vlgmr.msra.gmra.mxu1 %vm179_vm2, %v115_v32 }
 0x1a9   :  { %v241_v35 = vpop.f32.mrf.mxu1 }
 0x1aa   :  { %v242_v36 = vadd.f32 %v268_v34, %v241_v35 }
 0x1ab   :  { %v322_v37 = vpop.f32.mrf.mxu1 }
 0x1ac   :  { %247 = vst [vmem:[#allocation2] sm:$0xff] %v242_v36 }
 0x1ad   :  { %v244_v38 = vpop.f32.mrf.mxu1 }
 0x1ae   :  { %350 = shalt.err (!%p347_p4)
}
 0x1af   :  { %257 = dma.vmem_to_hbm [thread:$0]  %s255_s21, 128, %s461_s5, [#allocation3]   ;;  %v323_v39 = vpop.f32.mrf.mxu1 }
 0x1b0   :  { %359 = dma.done.wait [#allocation3], 128  }
 0x1b1   :  { %360 = vsyncadd [#allocation3], 4294967168 }
 0x1b2   :  { %261 = vsyncpa [#allocation3], 1 }

</bundles_post_ra>
